<compile_context>
chip_gen: v7x
topology: tpu7x:2x2x1
jax: 0.10.0
libtpu: 0.0.40
codegen_flags: <defaults>
</compile_context>

<pallas_src>
import functools

import jax
import jax.numpy as jnp
from jax.experimental import pallas as pl
from jax.experimental.pallas import tpu as pltpu


_SINGLE_BLOCK_MAX_ROWS = 2048   # M = nframes*bs at/below this: one VMEM block, no grid
_TARGET_TILE_ROWS = 2048        # ~rows (frames*bs) per grid step on the gridded path


def _round_up(x, m):
    return (x + m - 1) // m * m


def _batch_rows(bi, tf, bs):
    # Rows of the frame-major (tf*bs, D) tile belonging to batch `bi`:
    # row = t*bs + bi for t = 0..tf-1  -> static strided slice.
    if bs == 1:
        return pl.ds(0, tf)
    return pl.ds(bi, tf, stride=bs)


# ----------------------------------------------------------------------
# Kernels
# ----------------------------------------------------------------------
def _linear_kernel(x_ref, w_ref, b_ref, o_ref, *, bs, tf):
    """o[b, f, t] = x[t*bs + b, :] @ w[:, f] + bias[f].

    x_ref: (tf*bs, D) frame-major rows; w_ref: (D, F); b_ref: (F, 1);
    o_ref: (bs, F, tf)  (features on sublanes, frames lane-dense).
    """
    w = w_ref[...]
    b = b_ref[...]
    for bi in range(bs):                                   # static unroll (bs small)
        xb = x_ref[_batch_rows(bi, tf, bs), :]             # (tf, D)
        acc = jnp.dot(xb, w, preferred_element_type=jnp.float32)   # (tf, F) MXU
        o_ref[bi, :, :] = (acc.T + b).astype(o_ref.dtype)  # XLU transpose + VPU add


def _rot_vel_kernel(x_ref, wp_ref, bp_ref, wv_ref, bv_ref, o_ref, *,
                    bs, tf, gridded):
    """Fused 'rot_vel': frame 0 -> poseFinal, frames >= 1 -> velFinal."""
    wv = wv_ref[...]
    bv = bv_ref[...]
    n_feat = o_ref.shape[1]

    def vel_only():
        # Steady-state tiles: single matmul per batch, plain stores.
        for bi in range(bs):
            xb = x_ref[_batch_rows(bi, tf, bs), :]
            acc = jnp.dot(xb, wv, preferred_element_type=jnp.float32)
            o_ref[bi, :, :] = (acc.T + bv).astype(o_ref.dtype)

    def with_pose():
        # Only the tile containing frame 0 pays for the pose matmul + select.
        wp = wp_ref[...]
        bp = bp_ref[...]
        frame = jax.lax.broadcasted_iota(jnp.int32, (n_feat, tf), 1)  # lane == frame
        for bi in range(bs):
            xb = x_ref[_batch_rows(bi, tf, bs), :]
            acc_v = jnp.dot(xb, wv, preferred_element_type=jnp.float32).T + bv
            acc_p = jnp.dot(xb, wp, preferred_element_type=jnp.float32).T + bp
            o_ref[bi, :, :] = jnp.where(frame == 0, acc_p, acc_v).astype(o_ref.dtype)

    if not gridded:
        with_pose()
    else:
        pl.when(pl.program_id(0) == 0)(with_pose)
        pl.when(pl.program_id(0) != 0)(vel_only)


# ----------------------------------------------------------------------
# pallas_call wrappers
# ----------------------------------------------------------------------
def _choose_frame_tiling(nframes, bs):
    """Frame-tile size (multiple of 128 -> lane-dense output blocks) + step count.

    Step count is nudged to an even number when > 1 so the 'parallel' grid
    splits evenly across v7x's two TensorCores (no-op on v5e / v6e).
    """
    tf = max(128, (max(_TARGET_TILE_ROWS // bs, 1) // 128) * 128)
    n = pl.cdiv(nframes, tf)
    if n <= 1:
        return tf, n
    best = (tf, n)
    for cand in range(_round_up(n, 2), 1, -2):       # even candidates, largest first
        tf_c = _round_up(pl.cdiv(nframes, cand), 128)
        steps = pl.cdiv(nframes, tf_c)
        if steps % 2 == 0:
            best = (tf_c, steps)
            break
    return best


def pose_linear_pallas(x3, w, b):
    """x3: (nframes, bs, D) -> (bs, F, nframes) = (x @ w + b), frames-last."""
    nframes, bs, D = x3.shape
    F = w.shape[1]
    dtype = x3.dtype
    M = nframes * bs
    x2d = x3.reshape(M, D)          # free view: collapses leading dims, no copy

    if M <= _SINGLE_BLOCK_MAX_ROWS:
        kern = functools.partial(_linear_kernel, bs=bs, tf=nframes)
        return pl.pallas_call(
            kern,
            out_shape=jax.ShapeDtypeStruct((bs, F, nframes), dtype),
            in_specs=[pl.BlockSpec(memory_space=pltpu.MemorySpace.VMEM)] * 3,
            out_specs=pl.BlockSpec(memory_space=pltpu.MemorySpace.VMEM),
        )(x2d, w, b)

    tf, n = _choose_frame_tiling(nframes, bs)
    kern = functools.partial(_linear_kernel, bs=bs, tf=tf)
    return pl.pallas_call(
        kern,
        out_shape=jax.ShapeDtypeStruct((bs, F, nframes), dtype),
        grid=(n,),
        in_specs=[
            pl.BlockSpec((tf * bs, D), lambda t: (t, 0)),   # frame-tile of rows
            pl.BlockSpec((D, F), lambda t: (0, 0)),         # VMEM-resident weight
            pl.BlockSpec((F, 1), lambda t: (0, 0)),         # VMEM-resident bias
        ],
        out_specs=pl.BlockSpec((bs, F, tf), lambda t: (0, 0, t)),
        compiler_params=pltpu.CompilerParams(
            dimension_semantics=("parallel",)),
    )(x2d, w, b)


def rot_vel_pallas(x3, wp, bp, wv, bv):
    """Fused rot_vel branch: pose on frame 0, vel on the rest; frames-last out."""
    nframes, bs, D = x3.shape
    F = wp.shape[1]
    dtype = x3.dtype
    M = nframes * bs
    x2d = x3.reshape(M, D)

    if M <= _SINGLE_BLOCK_MAX_ROWS:
        kern = functools.partial(_rot_vel_kernel, bs=bs, tf=nframes, gridded=False)
        return pl.pallas_call(
            kern,
            out_shape=jax.ShapeDtypeStruct((bs, F, nframes), dtype),
            in_specs=[pl.BlockSpec(memory_space=pltpu.MemorySpace.VMEM)] * 5,
            out_specs=pl.BlockSpec(memory_space=pltpu.MemorySpace.VMEM),
        )(x2d, wp, bp, wv, bv)

    tf, n = _choose_frame_tiling(nframes, bs)
    kern = functools.partial(_rot_vel_kernel, bs=bs, tf=tf, gridded=True)
    return pl.pallas_call(
        kern,
        out_shape=jax.ShapeDtypeStruct((bs, F, nframes), dtype),
        grid=(n,),
        in_specs=[
            pl.BlockSpec((tf * bs, D), lambda t: (t, 0)),
            pl.BlockSpec((D, F), lambda t: (0, 0)),
            pl.BlockSpec((F, 1), lambda t: (0, 0)),
            pl.BlockSpec((D, F), lambda t: (0, 0)),
            pl.BlockSpec((F, 1), lambda t: (0, 0)),
        ],
        out_specs=pl.BlockSpec((bs, F, tf), lambda t: (0, 0, t)),
        compiler_params=pltpu.CompilerParams(
            dimension_semantics=("parallel",)),
    )(x2d, wp, bp, wv, bv)


# ----------------------------------------------------------------------
# Module
# ----------------------------------------------------------------------
class OutputProcessPallas:
    """JAX/Pallas port of OutputProcess (synthetic deterministic params)."""

    def __init__(self, data_rep, input_feats, latent_dim, njoints, nfeats, key):
        self.data_rep = data_rep
        self.input_feats = input_feats
        self.latent_dim = latent_dim
        self.njoints = njoints
        self.nfeats = nfeats

        k1, k2, k3, k4 = jax.random.split(key, 4)
        scale = 1.0 / float(latent_dim) ** 0.5

        # PyTorch Linear stores weight as (out, in); keep the (in, out)
        # transpose so the kernel computes x @ w directly.  No padding:
        # the feature dim rides on sublanes of the kernel output.
        self.pose_w = jax.random.uniform(k1, (latent_dim, input_feats),
                                         jnp.float32, -scale, scale)
        self.pose_b = jax.random.uniform(k2, (input_feats, 1),
                                         jnp.float32, -scale, scale)
        if data_rep == 'rot_vel':
            self.vel_w = jax.random.uniform(k3, (latent_dim, input_feats),
                                            jnp.float32, -scale, scale)
            self.vel_b = jax.random.uniform(k4, (input_feats, 1),
                                            jnp.float32, -scale, scale)

    def __call__(self, output):
        nframes, bs, d = output.shape
        if self.data_rep in ['rot6d', 'xyz', 'hml_vec']:
            y = pose_linear_pallas(output, self.pose_w, self.pose_b)
        elif self.data_rep == 'rot_vel':
            y = rot_vel_pallas(output, self.pose_w, self.pose_b,
                               self.vel_w, self.vel_b)
        else:
            raise ValueError(self.data_rep)
        # Kernel already produced (bs, F, nframes); the torch permute(1,2,3,0)
        # is fused into it.  This reshape is a free view (splits axis 1).
        return y.reshape(bs, self.njoints, self.nfeats, nframes)


# ----------------------------------------------------------------------
# Pure-jnp reference & self-test
# ----------------------------------------------------------------------
def _reference(output, module):
    nframes, bs, d = output.shape
    bp = module.pose_b[:, 0]
    if module.data_rep == 'rot_vel':
        bv = module.vel_b[:, 0]
        first = output[0:1] @ module.pose_w + bp
        vel = output[1:] @ module.vel_w + bv
        y = jnp.concatenate([first, vel], axis=0)
    else:
        y = output @ module.pose_w + bp
    y = y.reshape(nframes, bs, module.njoints, module.nfeats)
    return jnp.transpose(y, (1, 2, 3, 0))


if __name__ == "__main__":
    key = jax.random.PRNGKey(0)
    k_in, k_in_big, k_p1, k_p2, k_p3, k_p4 = jax.random.split(key, 6)

    njoints, nfeats = 6, 4
    input_feats = njoints * nfeats        # F = 24
    latent_dim = 32                       # D = 32

    ok = True

    # --- small shapes: single-block (no-grid) path ---------------------
    nframes, bs = 8, 2
    x = jax.random.normal(k_in, (nframes, bs, latent_dim), jnp.float32)

    mod = OutputProcessPallas('rot6d', input_feats, latent_dim, njoints,
                              nfeats, k_p1)
    out = jax.block_until_ready(mod(x))
    assert out.shape == (bs, njoints, nfeats, nframes)
    ok &= bool(jnp.allclose(out, _reference(x, mod), atol=1e-5, rtol=1e-5))

    mod_rv = OutputProcessPallas('rot_vel', input_feats, latent_dim, njoints,
                                 nfeats, k_p2)
    out_rv = jax.block_until_ready(mod_rv(x))
    assert out_rv.shape == (bs, njoints, nfeats, nframes)
    ok &= bool(jnp.allclose(out_rv, _reference(x, mod_rv),
                            atol=1e-5, rtol=1e-5))

    # --- larger M: exercises the frame-tiled, 'parallel' grid path -----
    # M = 520*4 = 2080 > 2048 -> gridded: 2 steps of tf=384 frames (ragged
    # last tile masked by Pallas), even step count for v7x balance.
    nframes_b, bs_b = 520, 4
    xb = jax.random.normal(k_in_big, (nframes_b, bs_b, latent_dim),
                           jnp.float32)

    mod_big = OutputProcessPallas('rot6d', input_feats, latent_dim, njoints,
                                  nfeats, k_p3)
    out_big = jax.block_until_ready(mod_big(xb))
    assert out_big.shape == (bs_b, njoints, nfeats, nframes_b)
    ok &= bool(jnp.allclose(out_big, _reference(xb, mod_big),
                            atol=1e-5, rtol=1e-5))

    mod_big_rv = OutputProcessPallas('rot_vel', input_feats, latent_dim,
                                     njoints, nfeats, k_p4)
    out_big_rv = jax.block_until_ready(mod_big_rv(xb))
    assert out_big_rv.shape == (bs_b, njoints, nfeats, nframes_b)
    ok &= bool(jnp.allclose(out_big_rv, _reference(xb, mod_big_rv),
                            atol=1e-5, rtol=1e-5))

    if ok:
        print("KERNEL_OK")
    else:
        print("MISMATCH")
</pallas_src>

<mosaic_0001>
module attributes {stable_mosaic.version = 11 : i64} {
  func.func @_linear_kernel(%arg0: memref<16x32xf32, #tpu.memory_space<vmem>>, %arg1: memref<32x24xf32, #tpu.memory_space<vmem>>, %arg2: memref<24x1xf32, #tpu.memory_space<vmem>>, %arg3: memref<2x24x8xf32, #tpu.memory_space<vmem>>) attributes {dimension_semantics = [], scalar_prefetch = 0 : i64, scratch_operands = 0 : i64, tpu.core_type = #tpu.core_type<tc>} {
    %c0 = arith.constant 0 : index
    %c0_0 = arith.constant 0 : index
    %0 = vector.load %arg1[%c0, %c0_0] : memref<32x24xf32, #tpu.memory_space<vmem>>, vector<32x24xf32>
    %c0_1 = arith.constant 0 : index
    %c0_2 = arith.constant 0 : index
    %1 = vector.load %arg2[%c0_1, %c0_2] : memref<24x1xf32, #tpu.memory_space<vmem>>, vector<24x1xf32>
    %c0_3 = arith.constant 0 : index
    %c0_4 = arith.constant 0 : index
    %2 = tpu.strided_load %arg0[%c0_3, %c0_4] {strides = array<i32: 2, 1>} : memref<16x32xf32, #tpu.memory_space<vmem>>, vector<8x32xf32>
    %cst = arith.constant dense<0.000000e+00> : vector<8x24xf32>
    %3 = tpu.matmul %2, %0, %cst {dimension_numbers = #tpu.dot_dimension_numbers<[1], [0], [0], [1], [0, 0, 1, 1], [], []>} : vector<8x32xf32>, vector<32x24xf32>, vector<8x24xf32> -> vector<8x24xf32>
    %4 = tpu.transpose %3, [1, 0] : vector<8x24xf32> -> vector<24x8xf32>
    %5 = vector.broadcast %1 : vector<24x1xf32> to vector<24x8xf32>
    %6 = arith.addf %4, %5 : vector<24x8xf32>
    %c0_5 = arith.constant 0 : index
    %c0_6 = arith.constant 0 : index
    %c0_7 = arith.constant 0 : index
    %7 = vector.load %arg3[%c0_5, %c0_6, %c0_7] : memref<2x24x8xf32, #tpu.memory_space<vmem>>, vector<1x24x8xf32>
    %8 = vector.shape_cast %7 : vector<1x24x8xf32> to vector<24x8xf32>
    %9 = vector.shape_cast %6 : vector<24x8xf32> to vector<1x24x8xf32>
    tpu.vector_store %arg3[%c0_5, %c0_6, %c0_7], %9 {strides = array<i32>} : memref<2x24x8xf32, #tpu.memory_space<vmem>>, vector<1x24x8xf32>,
    %c1 = arith.constant 1 : index
    %c0_8 = arith.constant 0 : index
    %10 = tpu.strided_load %arg0[%c1, %c0_8] {strides = array<i32: 2, 1>} : memref<16x32xf32, #tpu.memory_space<vmem>>, vector<8x32xf32>
    %cst_9 = arith.constant dense<0.000000e+00> : vector<8x24xf32>
    %11 = tpu.matmul %10, %0, %cst_9 {dimension_numbers = #tpu.dot_dimension_numbers<[1], [0], [0], [1], [0, 0, 1, 1], [], []>} : vector<8x32xf32>, vector<32x24xf32>, vector<8x24xf32> -> vector<8x24xf32>
    %12 = tpu.transpose %11, [1, 0] : vector<8x24xf32> -> vector<24x8xf32>
    %13 = vector.broadcast %1 : vector<24x1xf32> to vector<24x8xf32>
    %14 = arith.addf %12, %13 : vector<24x8xf32>
    %c1_10 = arith.constant 1 : index
    %c0_11 = arith.constant 0 : index
    %c0_12 = arith.constant 0 : index
    %15 = vector.load %arg3[%c1_10, %c0_11, %c0_12] : memref<2x24x8xf32, #tpu.memory_space<vmem>>, vector<1x24x8xf32>
    %16 = vector.shape_cast %15 : vector<1x24x8xf32> to vector<24x8xf32>
    %17 = vector.shape_cast %14 : vector<24x8xf32> to vector<1x24x8xf32>
    tpu.vector_store %arg3[%c1_10, %c0_11, %c0_12], %17 {strides = array<i32>} : memref<2x24x8xf32, #tpu.memory_space<vmem>>, vector<1x24x8xf32>,
    return
  }
}

</mosaic_0001>

<bundles_post_ra>
// kernel: tpu_custom_call.1
= control target key start
LH: loop header
LB: loop body
LE: loop exit
PB: predicated region body
PF: predicated region fallthrough
CT: control target
= control target key end

     0   :  { %v324_v0 = vmov 0.0|0.0   ;;  %vm325_vm0 = vmmov 0   ;;  %v326_v6 = vmov 0.0   ;;  %v327_v7 = vmov 0   ;;  %s399_s1 = inlined_call_operand.vmem [shape: f32[32,24], index: 1, kind: input, shape index: {}]   ;;  %s400_s2 = inlined_call_operand.vmem [shape: f32[24,1], index: 2, kind: input, shape index: {}]   ;;  %s401_s0 = inlined_call_operand.vmem [shape: f32[16,32], index: 0, kind: input, shape index: {}]   ;;  %s402_s3 = inlined_call_operand.vmem [shape: f32[2,24,8], index: 3, kind: output, shape index: {}]  }
   0x1   :  { %306 = vmatprep.subr.bf16.mxu0 %v324_v0  ;;  %312 = vmatprep.subr.bf16.mxu1 %v324_v0  ;;  %v14_v1 = vld [vmem:[%s399_s1] sm:$0xff]  ;;  %v15_v2 = vld [vmem:[%s399_s1 + $0x8] sm:$0xff]  ;;  %v16_v3 = vld [vmem:[%s399_s1 + $0x10] sm:$0xff]  ;;  %vm22_vm1 = vcmask 261120   ;;  %vm146_vm2 = vcmask 64512  }
   0x2   :  { %v307_v4 = vpack.c.bf16 %v15_v2, %v14_v1  ;;  %v17_v5 = vld [vmem:[%s399_s1 + $0x18] sm:$0xff]  ;;  %292 = vmatprep.mubr.msk.f32.mxu0 %vm325_vm0, %v326_v6  ;;  %303 = vmatprep.mubr.msk.f32.mxu1 %vm325_vm0, %v326_v6  ;;  %v20_v8 = vld [vmem:[%s400_s2 + $0x10] sm:$0xff]  ;;  %v18_v9 = vld [vmem:[%s400_s2] sm:$0xff] }
   0x3   :  { %323 = vset.pattern.permute.xlu1 %v327_v7  ;;  %322 = vset.pattern.permute.xlu0 %v327_v7  ;;  %v310_v10 = vpack.c.bf16 %v17_v5, %v16_v3  ;;  %v19_v11 = vld [vmem:[%s400_s2 + $0x8] sm:$0xff] }
   0x4   :  { %308 = vmatpush3.bf16.msra.mxu0 %v307_v4  ;;  %314 = vmatpush3.bf16.msra.mxu1 %v307_v4  ;;  %v21_v12 = vld [vmem:[%s401_s0] ss:$2 sm:$0xff]  ;;  %v269_v13 = vld [vmem:[%s401_s0 + $0x1] ss:$2 sm:$0xff] }
   0x5   :  { %309 = vmatprep.subr.bf16.mxu0 %v324_v0  ;;  %315 = vmatprep.subr.bf16.mxu1 %v324_v0 }
   0x6   :  { %140 = vperm.xlu1 %323, %v20_v8   ;;  %130 = vperm.xlu0 %322, %v18_v9  }
   0x8   :  { %311 = vmatpush3.bf16.msra.mxu0 %v310_v10  ;;  %317 = vmatpush3.bf16.msra.mxu1 %v310_v10 }
   0xa   :  { %135 = vperm.xlu0 %322, %v19_v11  }
   0xb   :  { %293 = vmatmul.mubr.msk.f32.vlgmr.msra.gmra.mrb[0].mxu0 %vm22_vm1, %v21_v12  ;;  %304 = vmatmul.mubr.msk.f32.vlgmr.msra.gmra.mrb[0].mxu1 %vm22_vm1, %v269_v13 }
  0x85   :  { %v131_v18 = vpop.permute.xlu0 %130  ;;  %v141_v19 = vpop.permute.xlu1 %140 }
  0x89   :  { %v136_v20 = vpop.permute.xlu0 %135 }
  0xde   :  { %v92_v14 = vpop.f32.mrb[0].mxu0  ;;  %v221_v15 = vpop.f32.mrb[0].mxu1 }
  0xdf   :  { %225 = vxpose.xlu0.b32.start.end [1/1] (short) (narrow) %v221_v15, 24  ;;  %v305_v16 = vpop.f32.mrb[1].mxu1  ;;  %96 = vxpose.xlu1.b32.start.end [1/1] (short) (narrow) %v92_v14, 24  ;;  %v294_v17 = vpop.f32.mrb[1].mxu0 }
 0x15f   :  { %v241_v21 = vpop.trf.xlu0  ;;  %v112_v22 = vpop.trf.xlu1 }
 0x160   :  { %v257_v23 = vadd.f32 %v241_v21, %v131_v18  ;;  %v143_v24 = vadd.f32 %v131_v18, %v112_v22 }
 0x162   :  { %271 = vst.msk [vmem:[%s402_s3 + $0x18] sm:$0xff] %vm146_vm2, %v257_v23  ;;  %147 = vst.msk [vmem:[%s402_s3] sm:$0xff] %vm146_vm2, %v143_v24 }
 0x163   :  { %v242_v25 = vpop.trf.xlu0  ;;  %v113_v26 = vpop.trf.xlu1 }
 0x164   :  { %v258_v27 = vadd.f32 %v242_v25, %v136_v20  ;;  %v144_v28 = vadd.f32 %v136_v20, %v113_v26 }
 0x166   :  { %272 = vst.msk [vmem:[%s402_s3 + $0x20] sm:$0xff] %vm146_vm2, %v258_v27  ;;  %148 = vst.msk [vmem:[%s402_s3 + $0x8] sm:$0xff] %vm146_vm2, %v144_v28 }
 0x167   :  { %v243_v29 = vpop.trf.xlu0  ;;  %v114_v30 = vpop.trf.xlu1 }
 0x168   :  { %v259_v31 = vadd.f32 %v243_v29, %v141_v19  ;;  %v145_v32 = vadd.f32 %v141_v19, %v114_v30 }
 0x16a   :  { %273 = vst.msk [vmem:[%s402_s3 + $0x28] sm:$0xff] %vm146_vm2, %v259_v31  ;;  %149 = vst.msk [vmem:[%s402_s3 + $0x10] sm:$0xff] %vm146_vm2, %v145_v32 }

</bundles_post_ra>
